<compile_context>
chip_gen: v7x
topology: tpu7x:2x2x1
jax: 0.10.0
libtpu: 0.0.40
codegen_flags: <defaults>
</compile_context>

<pallas_src>
import jax
import jax.numpy as jnp
import numpy as np
from jax.experimental import pallas as pl
from jax.experimental.pallas import tpu as pltpu


def attn_pool_kernel(emb_ref, mask_ref, w1_ref, b1_ref, w2_ref, b2_ref,
                     pooled_ref, weights_ref):
    # emb_ref:    (TB, Np, D)  block of TB batch elements (f32 or bf16)
    # mask_ref:   (TB, Np)     f32, 0 == invalid caption (padded slots are 0)
    # w1_ref:     (D, D)       pre-transposed Linear(D, D) weight, emb dtype
    # b1_ref:     (1, D)       f32
    # w2_ref:     (1, D)       f32, Linear(D, 1) weight as a row vector
    # b2_ref:     (1, 1)       f32 scalar in SMEM
    # pooled_ref: (TB, D)      emb dtype
    # weights_ref:(TB, Np)     f32
    TB, Np, D = emb_ref.shape

    e = emb_ref[...]                                            # (TB, Np, D)
    # Np is padded to the sublane tile in the wrapper -> free relayout.
    e_flat = e.reshape(TB * Np, D)

    # attention MLP: Linear(D, D) -> tanh -> Linear(D, 1)
    # One big MXU matmul per grid step; accumulate in f32.
    h = jnp.tanh(
        jnp.dot(e_flat, w1_ref[...], preferred_element_type=jnp.float32)
        + b1_ref[...]
    )                                                           # (TB*Np, D) f32

    # Second linear has output width 1: VPU multiply + lane reduce instead of
    # a 1-column MXU matmul.  h un-flatten is free (Np % 8 == 0).
    s = jnp.sum(h.reshape(TB, Np, D) * w2_ref[...].reshape(1, 1, D), axis=-1)
    s = s + b2_ref[0, 0]                                        # (TB, Np) f32

    # masked_fill(mask == 0, -10000.0); padded caption slots have mask == 0.
    s = jnp.where(mask_ref[...] == 0, jnp.float32(-10000.0), s)

    # softmax over the caption axis (lanes), all TB rows at once, in f32.
    s_max = jnp.max(s, axis=-1, keepdims=True)                  # (TB, 1)
    ex = jnp.exp(s - s_max)                                     # (TB, Np)
    denom = jnp.sum(ex, axis=-1, keepdims=True)                 # (TB, 1)
    w = ex / denom                                              # (TB, Np) f32

    # weighted pooling: pooled[b, :] = w[b, :] @ e[b, :, :]
    # Batched MXU contraction (q = 1) -> no (TB, Np, D) f32 temporary.
    w_row = w.astype(e.dtype).reshape(TB, 1, Np)
    pooled = jnp.einsum("bqn,bnd->bqd", w_row, e,
                        preferred_element_type=jnp.float32).reshape(TB, D)

    pooled_ref[...] = pooled.astype(pooled_ref.dtype)
    weights_ref[...] = w.astype(weights_ref.dtype)


def attention_pooling(embeddings, params, mask=None, *, block_b=None,
                      target_block_bytes=4 << 20):
    """Pallas implementation of AttentionPooling.forward.

    embeddings: [B, N, D] (f32 or bf16)
    mask:       [B, N] (optional; nonzero == valid caption)
    returns (pooled_embeddings [B, D] in emb dtype, attention_weights [B, N] f32)
    """
    B, N, D = embeddings.shape
    dtype = embeddings.dtype
    dtype_bytes = jnp.dtype(dtype).itemsize

    if mask is None:
        mask2 = jnp.ones((B, N), dtype=jnp.float32)
    else:
        mask2 = mask.astype(jnp.float32).reshape(B, N)

    # Pad N to the sublane tile (8 for 4-byte, 16 for 2-byte dtypes) so the
    # in-kernel (TB*Np, D) flatten never crosses (8,128) tile boundaries.
    sub = max(8, 32 // max(dtype_bytes, 1))
    Np = max(sub, ((N + sub - 1) // sub) * sub)
    if Np != N:
        embeddings = jnp.pad(embeddings, ((0, 0), (0, Np - N), (0, 0)))
        mask2 = jnp.pad(mask2, ((0, 0), (0, Np - N)))   # padded captions -> mask 0

    # Batch block sized from a VMEM byte budget (~4 MiB of embeddings per
    # step): this kernel is HBM-bandwidth bound, big blocks amortize the
    # ~0.35us/step pipeline overhead.  (On v7x with 2 TCs, prefer n_blocks
    # even so "parallel" loads both cores.)
    if block_b is None:
        rows = max(1, target_block_bytes // (Np * D * dtype_bytes))
        block_b = int(min(rows, 4096))
    block_b = max(8, (int(block_b) // 8) * 8)           # sublane-aligned 2-D blocks
    block_b = min(block_b, ((B + 7) // 8) * 8)
    n_blocks = pl.cdiv(B, block_b)
    Bp = n_blocks * block_b
    if Bp != B:
        embeddings = jnp.pad(embeddings, ((0, Bp - B), (0, 0), (0, 0)))
        mask2 = jnp.pad(mask2, ((0, Bp - B), (0, 0)))   # padded rows discarded later

    # PyTorch Linear stores W as (out, in) and computes x @ W.T + b.
    # w1 follows the embeddings dtype (bf16 keeps the MXU feed narrow);
    # everything touching tanh/softmax stays f32.
    w1_t = jnp.asarray(params["w1"]).T.astype(dtype)             # (D, D)
    b1 = jnp.asarray(params["b1"]).reshape(1, D).astype(jnp.float32)
    w2_row = jnp.asarray(params["w2"]).reshape(1, D).astype(jnp.float32)
    b2 = jnp.asarray(params["b2"]).reshape(1, 1).astype(jnp.float32)

    # Explicit VMEM budget: 2x double-buffered (emb + mask + outputs) +
    # resident w1/b1/w2 + the f32 `h` temp, with slack.  Capped well under
    # v7x's 64 MiB physical VMEM.
    emb_blk = block_b * Np * D * dtype_bytes
    mask_blk = block_b * Np * 4
    out_blk = block_b * (D * dtype_bytes + Np * 4)
    h_tmp = block_b * Np * D * 4
    w_bytes = D * D * dtype_bytes + 2 * D * 4
    need = 2 * (emb_blk + mask_blk + out_blk) + h_tmp + w_bytes + (2 << 20)
    vmem_limit = int(min(max(need, 16 << 20), 48 << 20))

    pooled, weights = pl.pallas_call(
        attn_pool_kernel,
        out_shape=(
            jax.ShapeDtypeStruct((Bp, D), dtype),
            jax.ShapeDtypeStruct((Bp, Np), jnp.float32),
        ),
        grid_spec=pltpu.PrefetchScalarGridSpec(
            num_scalar_prefetch=0,
            grid=(n_blocks,),
            in_specs=[
                pl.BlockSpec((block_b, Np, D), lambda b: (b, 0, 0)),   # embeddings
                pl.BlockSpec((block_b, Np), lambda b: (b, 0)),         # mask
                pl.BlockSpec((D, D), lambda b: (0, 0)),                # W1^T (resident)
                pl.BlockSpec((1, D), lambda b: (0, 0)),                # b1
                pl.BlockSpec((1, D), lambda b: (0, 0)),                # W2 row
                pl.BlockSpec(memory_space=pltpu.MemorySpace.SMEM),     # b2 scalar
            ],
            out_specs=[
                pl.BlockSpec((block_b, D), lambda b: (b, 0)),          # pooled
                pl.BlockSpec((block_b, Np), lambda b: (b, 0)),         # weights
            ],
        ),
        compiler_params=pltpu.CompilerParams(
            dimension_semantics=("parallel",),
            vmem_limit_bytes=vmem_limit),
    )(embeddings, mask2, w1_t, b1, w2_row, b2)

    return pooled[:B], weights[:B, :N]


def reference_attention_pooling(embeddings, params, mask=None):
    """Pure-JAX reference mirroring the PyTorch forward exactly (f32)."""
    h = jnp.tanh(jnp.einsum("bnd,ed->bne", embeddings, params["w1"]) + params["b1"])
    scores = jnp.einsum("bne,oe->bno", h, params["w2"]).squeeze(-1) + params["b2"]
    if mask is not None:
        scores = jnp.where(mask == 0, -10000.0, scores)
    weights = jax.nn.softmax(scores, axis=-1)
    pooled = jnp.einsum("bn,bnd->bd", weights, embeddings)
    return pooled, weights


if __name__ == "__main__":
    D = 32  # embed_dim (toy)

    key = jax.random.PRNGKey(0)
    k_emb, k_w1, k_b1, k_w2, k_b2, k_emb2, k_mask2 = jax.random.split(key, 7)

    # Deterministic parameter init (nn.Linear shapes: W=(out,in), b=(out,))
    params = {
        "w1": jax.random.normal(k_w1, (D, D), dtype=jnp.float32) * 0.1,
        "b1": jax.random.normal(k_b1, (D,), dtype=jnp.float32) * 0.1,
        "w2": jax.random.normal(k_w2, (1, D), dtype=jnp.float32) * 0.1,
        "b2": jax.random.normal(k_b2, (1,), dtype=jnp.float32) * 0.1,
    }

    # --- test 1: small case, single grid step, f32 (exact path) --------------
    B, N = 2, 8
    embeddings = jax.random.normal(k_emb, (B, N, D), dtype=jnp.float32)
    mask = jnp.array([[1, 1, 1, 1, 1, 0, 0, 0],
                      [1, 1, 1, 1, 1, 1, 1, 0]], dtype=jnp.float32)

    pooled, weights = attention_pooling(embeddings, params, mask)
    jax.block_until_ready((pooled, weights))
    ref_pooled, ref_weights = reference_attention_pooling(embeddings, params, mask)
    np.testing.assert_allclose(np.asarray(pooled), np.asarray(ref_pooled),
                               rtol=1e-5, atol=1e-5)
    np.testing.assert_allclose(np.asarray(weights), np.asarray(ref_weights),
                               rtol=1e-5, atol=1e-5)

    # --- test 2: multi-block grid + batch padding, f32 -----------------------
    B2, N2 = 20, 8
    embeddings2 = jax.random.normal(k_emb2, (B2, N2, D), dtype=jnp.float32)
    mask2 = (jax.random.uniform(k_mask2, (B2, N2)) > 0.3).astype(jnp.float32)
    mask2 = mask2.at[:, 0].set(1.0)  # at least one valid caption per row

    pooled2, weights2 = attention_pooling(embeddings2, params, mask2, block_b=8)
    jax.block_until_ready((pooled2, weights2))
    ref_pooled2, ref_weights2 = reference_attention_pooling(embeddings2, params, mask2)
    np.testing.assert_allclose(np.asarray(pooled2), np.asarray(ref_pooled2),
                               rtol=1e-5, atol=1e-5)
    np.testing.assert_allclose(np.asarray(weights2), np.asarray(ref_weights2),
                               rtol=1e-5, atol=1e-5)

    # --- test 3: bf16 embedding stream (halved HBM traffic), N padded 8->16 --
    emb_bf16 = embeddings2.astype(jnp.bfloat16)
    pooled3, weights3 = attention_pooling(emb_bf16, params, mask2)
    jax.block_until_ready((pooled3, weights3))
    ref_pooled3, ref_weights3 = reference_attention_pooling(
        emb_bf16.astype(jnp.float32), params, mask2)
    np.testing.assert_allclose(np.asarray(pooled3.astype(jnp.float32)),
                               np.asarray(ref_pooled3), rtol=3e-2, atol=3e-2)
    np.testing.assert_allclose(np.asarray(weights3), np.asarray(ref_weights3),
                               rtol=3e-2, atol=3e-2)

    print("KERNEL_OK")
</pallas_src>

<mosaic_0001>
module attributes {stable_mosaic.version = 11 : i64} {
  func.func @attn_pool_kernel(%arg0: i32, %arg1: memref<8x8x32xf32, #tpu.memory_space<vmem>>, %arg2: memref<8x8xf32, #tpu.memory_space<vmem>>, %arg3: memref<32x32xf32, #tpu.memory_space<vmem>>, %arg4: memref<1x32xf32, #tpu.memory_space<vmem>>, %arg5: memref<1x32xf32, #tpu.memory_space<vmem>>, %arg6: memref<1x1xf32, #tpu.memory_space<smem>>, %arg7: memref<8x32xf32, #tpu.memory_space<vmem>>, %arg8: memref<8x8xf32, #tpu.memory_space<vmem>>) attributes {dimension_semantics = [#tpu.dimension_semantics<parallel>], iteration_bounds = array<i64: 1>, scalar_prefetch = 0 : i64, scratch_operands = 0 : i64, tpu.core_type = #tpu.core_type<tc>, window_params = [{transform_indices = @transform_0, window_bounds = array<i64: 8, 8, 32>}, {transform_indices = @transform_1, window_bounds = array<i64: 8, 8>}, {pipeline_mode = #tpu.pipeline_mode<synchronous>, transform_indices = @transform_2, window_bounds = array<i64: 32, 32>}, {pipeline_mode = #tpu.pipeline_mode<synchronous>, transform_indices = @transform_3, window_bounds = array<i64: 1, 32>}, {pipeline_mode = #tpu.pipeline_mode<synchronous>, transform_indices = @transform_4, window_bounds = array<i64: 1, 32>}, {transform_indices = @transform_5, window_bounds = array<i64: 1, 1>}, {transform_indices = @transform_6, window_bounds = array<i64: 8, 32>}, {transform_indices = @transform_7, window_bounds = array<i64: 8, 8>}]} {
    %c0 = arith.constant 0 : index
    %c0_0 = arith.constant 0 : index
    %c0_1 = arith.constant 0 : index
    %0 = vector.load %arg1[%c0, %c0_0, %c0_1] : memref<8x8x32xf32, #tpu.memory_space<vmem>>, vector<8x8x32xf32>
    %1 = vector.shape_cast %0 : vector<8x8x32xf32> to vector<64x32xf32>
    %c0_2 = arith.constant 0 : index
    %c0_3 = arith.constant 0 : index
    %2 = vector.load %arg3[%c0_2, %c0_3] : memref<32x32xf32, #tpu.memory_space<vmem>>, vector<32x32xf32>
    %cst = arith.constant dense<0.000000e+00> : vector<64x32xf32>
    %3 = tpu.matmul %1, %2, %cst {dimension_numbers = #tpu.dot_dimension_numbers<[1], [0], [0], [1], [0, 0, 1, 1], [], []>} : vector<64x32xf32>, vector<32x32xf32>, vector<64x32xf32> -> vector<64x32xf32>
    %c0_4 = arith.constant 0 : index
    %c0_5 = arith.constant 0 : index
    %4 = vector.load %arg4[%c0_4, %c0_5] : memref<1x32xf32, #tpu.memory_space<vmem>>, vector<1x32xf32>
    %5 = vector.broadcast %4 : vector<1x32xf32> to vector<64x32xf32>
    %6 = arith.addf %3, %5 : vector<64x32xf32>
    %7 = math.tanh %6 : vector<64x32xf32>
    %8 = vector.shape_cast %7 : vector<64x32xf32> to vector<8x8x32xf32>
    %c0_6 = arith.constant 0 : index
    %c0_7 = arith.constant 0 : index
    %9 = vector.load %arg5[%c0_6, %c0_7] : memref<1x32xf32, #tpu.memory_space<vmem>>, vector<1x32xf32>
    %10 = vector.shape_cast %9 : vector<1x32xf32> to vector<1x1x32xf32>
    %11 = vector.broadcast %10 : vector<1x1x32xf32> to vector<8x8x32xf32>
    %12 = arith.mulf %8, %11 : vector<8x8x32xf32>
    %cst_8 = arith.constant dense<0.000000e+00> : vector<8x8xf32>
    %13 = vector.multi_reduction <add>, %12, %cst_8 [2] : vector<8x8x32xf32> to vector<8x8xf32>
    %c0_9 = arith.constant 0 : index
    %c0_10 = arith.constant 0 : index
    %14 = memref.load %arg6[%c0_9, %c0_10] : memref<1x1xf32, #tpu.memory_space<smem>>
    %15 = vector.broadcast %14 : f32 to vector<8x8xf32>
    %16 = arith.addf %13, %15 : vector<8x8xf32>
    %c0_11 = arith.constant 0 : index
    %c0_12 = arith.constant 0 : index
    %17 = vector.load %arg2[%c0_11, %c0_12] : memref<8x8xf32, #tpu.memory_space<vmem>>, vector<8x8xf32>
    %cst_13 = arith.constant 0.000000e+00 : f32
    %18 = vector.broadcast %cst_13 : f32 to vector<8x8xf32>
    %19 = arith.cmpf oeq, %17, %18 : vector<8x8xf32>
    %cst_14 = arith.constant -1.000000e+04 : f32
    %20 = vector.broadcast %cst_14 : f32 to vector<8x8xf32>
    %21 = arith.select %19, %20, %16 : vector<8x8xi1>, vector<8x8xf32>
    %cst_15 = arith.constant dense<0xFF800000> : vector<8xf32>
    %22 = vector.multi_reduction <maximumf>, %21, %cst_15 [1] : vector<8x8xf32> to vector<8xf32>
    %23 = vector.shape_cast %22 : vector<8xf32> to vector<8x1xf32>
    %24 = vector.broadcast %23 : vector<8x1xf32> to vector<8x8xf32>
    %25 = arith.subf %21, %24 : vector<8x8xf32>
    %26 = math.exp %25 : vector<8x8xf32>
    %cst_16 = arith.constant dense<0.000000e+00> : vector<8xf32>
    %27 = vector.multi_reduction <add>, %26, %cst_16 [1] : vector<8x8xf32> to vector<8xf32>
    %28 = vector.shape_cast %27 : vector<8xf32> to vector<8x1xf32>
    %29 = vector.broadcast %28 : vector<8x1xf32> to vector<8x8xf32>
    %30 = arith.divf %26, %29 : vector<8x8xf32>
    %31 = vector.shape_cast %30 : vector<8x8xf32> to vector<8x1x8xf32>
    "tpu.trace_start"() <{level = 10 : i32, message = "bqn,bnd->bqd"}> : () -> ()
    %cst_17 = arith.constant dense<0.000000e+00> : vector<8x1x32xf32>
    %32 = tpu.matmul %31, %0, %cst_17 {dimension_numbers = #tpu.dot_dimension_numbers<[2], [1], [1], [2], [0, 0, 0, 1, 1, 2], [0], [0]>} : vector<8x1x8xf32>, vector<8x8x32xf32>, vector<8x1x32xf32> -> vector<8x1x32xf32>
    "tpu.trace_stop"() : () -> ()
    %33 = vector.shape_cast %32 : vector<8x1x32xf32> to vector<8x32xf32>
    %c0_18 = arith.constant 0 : index
    %c0_19 = arith.constant 0 : index
    %34 = vector.load %arg7[%c0_18, %c0_19] : memref<8x32xf32, #tpu.memory_space<vmem>>, vector<8x32xf32>
    tpu.vector_store %arg7[%c0_18, %c0_19], %33 {strides = array<i32>} : memref<8x32xf32, #tpu.memory_space<vmem>>, vector<8x32xf32>,
    %c0_20 = arith.constant 0 : index
    %c0_21 = arith.constant 0 : index
    %35 = vector.load %arg8[%c0_20, %c0_21] : memref<8x8xf32, #tpu.memory_space<vmem>>, vector<8x8xf32>
    tpu.vector_store %arg8[%c0_20, %c0_21], %30 {strides = array<i32>} : memref<8x8xf32, #tpu.memory_space<vmem>>, vector<8x8xf32>,
    return
  }
  func.func @transform_0(%arg0: i32) -> (i32, i32, i32) {
    %c0_i32 = arith.constant 0 : i32
    %c0_i32_0 = arith.constant 0 : i32
    %c0_i32_1 = arith.constant 0 : i32
    return %arg0, %c0_i32, %c0_i32_0 : i32, i32, i32
  }
  func.func @transform_1(%arg0: i32) -> (i32, i32) {
    %c0_i32 = arith.constant 0 : i32
    %c0_i32_0 = arith.constant 0 : i32
    return %arg0, %c0_i32 : i32, i32
  }
  func.func @transform_2(%arg0: i32) -> (i32, i32) {
    %c0_i32 = arith.constant 0 : i32
    %c0_i32_0 = arith.constant 0 : i32
    %c0_i32_1 = arith.constant 0 : i32
    return %c0_i32, %c0_i32_0 : i32, i32
  }
  func.func @transform_3(%arg0: i32) -> (i32, i32) {
    %c0_i32 = arith.constant 0 : i32
    %c0_i32_0 = arith.constant 0 : i32
    %c0_i32_1 = arith.constant 0 : i32
    return %c0_i32, %c0_i32_0 : i32, i32
  }
  func.func @transform_4(%arg0: i32) -> (i32, i32) {
    %c0_i32 = arith.constant 0 : i32
    %c0_i32_0 = arith.constant 0 : i32
    %c0_i32_1 = arith.constant 0 : i32
    return %c0_i32, %c0_i32_0 : i32, i32
  }
  func.func @transform_5(%arg0: i32) -> (i32, i32) {
    %c0_i32 = arith.constant 0 : i32
    %c0_i32_0 = arith.constant 0 : i32
    %c0_i32_1 = arith.constant 0 : i32
    return %c0_i32, %c0_i32_0 : i32, i32
  }
  func.func @transform_6(%arg0: i32) -> (i32, i32) {
    %c0_i32 = arith.constant 0 : i32
    %c0_i32_0 = arith.constant 0 : i32
    return %arg0, %c0_i32 : i32, i32
  }
  func.func @transform_7(%arg0: i32) -> (i32, i32) {
    %c0_i32 = arith.constant 0 : i32
    %c0_i32_0 = arith.constant 0 : i32
    return %arg0, %c0_i32 : i32, i32
  }
}

</mosaic_0001>

<bundles_post_ra>
// kernel: tpu_custom_call.1
= control target key start
LH: loop header
LB: loop body
LE: loop exit
PB: predicated region body
PF: predicated region fallthrough
CT: control target
= control target key end

     0   :  { %14 = vsyncpa [#allocation4], 0  ;;  %s1500_s0 = inlined_call_operand.hbm [shape: f32[8,8,32], index: 0, kind: input, shape index: {}]   ;;  %s1501_s1 = inlined_call_operand.hbm [shape: f32[8,8], index: 1, kind: input, shape index: {}]   ;;  %s1502_s2 = inlined_call_operand.hbm [shape: f32[32,32], index: 2, kind: input, shape index: {}]   ;;  %s1503_s3 = inlined_call_operand.vmem [shape: f32[1,32], index: 3, kind: input, shape index: {}]   ;;  %s1504_s4 = inlined_call_operand.vmem [shape: f32[1,32], index: 4, kind: input, shape index: {}]   ;;  %s1505_s5 = inlined_call_operand.<no memory space> [shape: f32[1,1], index: 5, kind: input, shape index: {}]   ;;  %s1506_s6 = inlined_call_operand.hbm [shape: f32[8,32], index: 6, kind: output, shape index: {0}]   ;;  %s1507_s7 = inlined_call_operand.hbm [shape: f32[8,8], index: 7, kind: output, shape index: {1}]  }
   0x1   :  { %15 = vsyncpa [#allocation7], 0 }
   0x2   :  { %16 = vsyncpa [#allocation5], 0 }
   0x3   :  { %17 = vsyncpa [#allocation11], 0  ;;  %s1288_s24 = smov [#allocation6]   ;;  %s1289_s26 = smov [#allocation3]  }
   0x4   :  { %s36_s25 = sshll.u32 %s1288_s24, 4  ;;  %s23_s27 = sshll.u32 %s1289_s26, 4  ;;  %s37_s25 = int_to_ptr.vmem [resolvable:$true] %s36_s25  ;;  %s1338_s27 = int_to_ptr.vmem [resolvable:$true] %s23_s27 }
   0x5   :  { %s1170_s30 = scalar_lea.hbm %s1501_s1, 128 }
   0x6   :  { %p1171_p0 = scmp.ne.s32.totalorder %s1501_s1, %s1170_s30  ;;  %p1174_p1 = scmp.lt.u32.totalorder %s1170_s30, %s1501_s1 }
   0x8   :  { %p1176_p2 = pnand %p1174_p1, %p1171_p0 }
   0xa   :  { %1179 = shalt.err (!%p1176_p2)
}
   0xb   :  { %s1180_s12 = scalar_lea.vmem %s37_s25, 128  ;;  %p1185_p4 = scmp.lt.s32.totalorder %s37_s25, %s37_s25 }
   0xc   :  { %p1181_p3 = scmp.ne.s32.totalorder %s37_s25, %s1180_s12  ;;  %p1186_p5 = scmp.lt.s32.totalorder %s1180_s12, %s1180_s12 }
   0xe   :  { %p1187_p6 = por %p1186_p5, %p1185_p4 }
  0x10   :  { %p1188_p7 = pnand %p1187_p6, %p1181_p3 }
  0x12   :  { %1191 = shalt.err (!%p1188_p7)
}
  0x13   :  { %39 = dma.hbm_to_vmem [thread:$0]  %s1501_s1, 128, %s37_s25, [#allocation7]  }
  0x14   :  { %s1192_s17 = scalar_lea.hbm %s1500_s0, 1024 }
  0x15   :  { %p1193_p8 = scmp.ne.s32.totalorder %s1500_s0, %s1192_s17  ;;  %p1196_p9 = scmp.lt.u32.totalorder %s1192_s17, %s1500_s0 }
  0x17   :  { %p1198_p10 = pnand %p1196_p9, %p1193_p8 }
  0x19   :  { %1201 = shalt.err (!%p1198_p10)
}
  0x1a   :  { %s1202_s22 = scalar_lea.vmem %s1338_s27, 1024  ;;  %p1207_p12 = scmp.lt.s32.totalorder %s1338_s27, %s1338_s27 }
  0x1b   :  { %p1203_p11 = scmp.ne.s32.totalorder %s1338_s27, %s1202_s22  ;;  %p1208_p13 = scmp.lt.s32.totalorder %s1202_s22, %s1202_s22 }
  0x1d   :  { %p1209_p0 = por %p1208_p13, %p1207_p12 }
  0x1f   :  { %p1210_p1 = pnand %p1209_p0, %p1203_p11 }
  0x21   :  { %1213 = shalt.err (!%p1210_p1)
}
  0x22   :  { %s1290_s1 = smov 128   ;;  %s1291_s23 = smov 8  }
  0x23   :  { %29 = dma.hbm_to_vmem [thread:$0]  %s1500_s0, 1024, %s1338_s27, [#allocation4], %s1290_s1, %s1290_s1, %s1291_s23  }
  0x24   :  { %s1292_s26 = smov [#allocation8]   ;;  %s1214_s8 = scalar_lea.hbm %s1502_s2, 512 }
  0x25   :  { %s45_s28 = sshll.u32 %s1292_s26, 4  ;;  %p1215_p2 = scmp.ne.s32.totalorder %s1502_s2, %s1214_s8  ;;  %s46_s28 = int_to_ptr.vmem [resolvable:$true] %s45_s28 }
  0x26   :  { %p1218_p3 = scmp.lt.u32.totalorder %s1214_s8, %s1502_s2 }
  0x28   :  { %p1220_p4 = pnand %p1218_p3, %p1215_p2 }
  0x2a   :  { %1223 = shalt.err (!%p1220_p4)
}
  0x2b   :  { %s1224_s13 = scalar_lea.vmem %s46_s28, 512  ;;  %p1229_p6 = scmp.lt.s32.totalorder %s46_s28, %s46_s28 }
  0x2c   :  { %p1225_p5 = scmp.ne.s32.totalorder %s46_s28, %s1224_s13  ;;  %p1230_p7 = scmp.lt.s32.totalorder %s1224_s13, %s1224_s13 }
  0x2e   :  { %p1231_p8 = por %p1230_p7, %p1229_p6 }
  0x30   :  { %p1232_p9 = pnand %p1231_p8, %p1225_p5 }
  0x32   :  { %1235 = shalt.err (!%p1232_p9)
}
  0x33   :  { %51 = dma.hbm_to_vmem [thread:$0]  %s1502_s2, 512, %s46_s28, [#allocation7], %s1290_s1, %s1290_s1, %s1291_s23  }
  0x34   :  { %1280 = dma.done.wait [#allocation4], 1024  }
  0x35   :  { %1281 = vsyncadd [#allocation4], 4294966272 }
  0x36   :  { %1282 = dma.done.wait [#allocation7], 640  }
  0x37   :  { %1283 = vsyncadd [#allocation7], 4294966656  ;;  %vm86_vm0 = vcmask 261120   ;;  %v75_v0 = vld [vmem:[#allocation8] sm:$0xff]  ;;  %v76_v1 = vld [vmem:[#allocation8 + $0x8] sm:$0xff]  ;;  %v283_v56 = vlaneseq  ;;  %v264_v60 = vstv %s1505_s5  ;;  %vm317_vm1 = vcmask 1041409  }
  0x38   :  { %v77_v2 = vld [vmem:[#allocation8 + $0x10] sm:$0xff]  ;;  %v1132_v3 = vpack.c.bf16 %v76_v1, %v75_v0  ;;  %v78_v4 = vld [vmem:[#allocation8 + $0x18] sm:$0xff]  ;;  %v1385_v7 = vld [vmem:[#allocation3 + $0x8] sm:$0xff]  ;;  %vm319_vm2 = vcmask 1042434   ;;  %vm321_vm3 = vcmask 1043459   ;;  %vm323_vm4 = vcmask 1044484  }
  0x39   :  { %v1381_v5 = vld [vmem:[#allocation3] sm:$0xff]  ;;  %v1136_v6 = vpack.c.bf16 %v78_v4, %v77_v2  ;;  %v1387_v8 = vld [vmem:[#allocation3 + $0x10] sm:$0xff]  ;;  %v1393_v9 = vld [vmem:[#allocation3 + $0x18] sm:$0xff]  ;;  %v284_v58 = vand.u32 127, %v283_v56  ;;  %v1427_v59 = vshrl.u32 %v283_v56, 7  ;;  %vm325_vm5 = vcmask 1045509  }
  0x3a   :  { %1080 = vmatprep.mubr.msk.f32.mxu0 %vm86_vm0, %v1381_v5  ;;  %1133 = vmatprep.subr.bf16.mxu0 %v1132_v3  ;;  %v1395_v10 = vld [vmem:[#allocation3 + $0x20] sm:$0xff]  ;;  %v1401_v11 = vld [vmem:[#allocation3 + $0x28] sm:$0xff]  ;;  %v1403_v12 = vld [vmem:[#allocation3 + $0x30] sm:$0xff]  ;;  %vm327_vm6 = vcmask 1046534   ;;  %vm329_vm7 = vcmask 1047559   ;;  %vm333_vm9 = vcmask 64512  }
  0x3b   :  { %1135 = vmatpush3.bf16.msra.mxu0 %v1132_v3  ;;  %v1409_v13 = vld [vmem:[#allocation3 + $0x38] sm:$0xff]  ;;  %v1026_v14 = vld [vmem:[%s1503_s3] ss:$0 sm:$0xff]  ;;  %v287_v0 = vsub.s32 %v284_v58, %v1427_v59  ;;  %vm1294_vm10 = vmmov 0   ;;  %s1296_s5 = smov [#allocation10]  }
  0x3c   :  { %1137 = vmatprep.subr.bf16.mxu0 %v1136_v6  ;;  %v1035_v27 = vld [vmem:[%s1504_s4] ss:$0 sm:$0xff]  ;;  %s1012_s17 = sshll.u32 %s1296_s5, 4  ;;  %s1013_s17 = int_to_ptr.vmem [resolvable:$true] %s1012_s17 }
  0x3d   :  { %s1236_s18 = scalar_lea.vmem %s1013_s17, 128  ;;  %p1241_p11 = scmp.lt.s32.totalorder %s1013_s17, %s1013_s17 }
  0x3e   :  { %p1237_p10 = scmp.ne.s32.totalorder %s1013_s17, %s1236_s18  ;;  %p1242_p12 = scmp.lt.s32.totalorder %s1236_s18, %s1236_s18 }
  0x3f   :  { %1139 = vmatpush3.bf16.msra.mxu0 %v1136_v6 }
  0x40   :  { %p1243_p13 = por %p1242_p12, %p1241_p11 }
  0x42   :  { %1081 = vmatmul.mubr.msk.f32.vlgmr.msra.gmra.mrb[0].mxu0 %vm86_vm0, %v1385_v7  ;;  %p1244_p0 = pnand %p1243_p13, %p1237_p10 }
  0x43   :  { %1083 = vmatprep.mubr.msk.f32.mxu0 %vm86_vm0, %v1387_v8 }
  0x46   :  { %1084 = vmatmul.mubr.msk.f32.gmra.mrb[2].mxu0 %vm86_vm0, %v1393_v9 }
  0x47   :  { %1086 = vmatprep.mubr.msk.f32.mxu0 %vm86_vm0, %v1395_v10 }
  0x4a   :  { %1087 = vmatmul.mubr.msk.f32.gmra.mrb[4].mxu0 %vm86_vm0, %v1401_v11 }
  0x4b   :  { %1089 = vmatprep.mubr.msk.f32.mxu0 %vm86_vm0, %v1403_v12 }
  0x4e   :  { %1090 = vmatmul.mubr.msk.f32.gmra.mrb[6].mxu0 %vm86_vm0, %v1409_v13 }
 0x115   :  { %v1082_v15 = vpop.f32.mrb[0].mxu0 }
 0x116   :  { %v183_v16 = vadd.f32 %v1082_v15, %v1026_v14  ;;  %v177_v17 = vpop.f32.mrb[1].mxu0 }
 0x117   :  { %v178_v18 = vadd.f32 %v1026_v14, %v177_v17 }
 0x118   :  { %1150 = vtanh.f32 %v183_v16 }
 0x119   :  { %1152 = vtanh.f32 %v178_v18  ;;  %v1085_v19 = vpop.f32.mrb[2].mxu0 }
 0x11a   :  { %v193_v20 = vadd.f32 %v1085_v19, %v1026_v14  ;;  %v187_v21 = vpop.f32.mrb[3].mxu0 }
 0x11b   :  { %v188_v22 = vadd.f32 %v1026_v14, %v187_v21 }
 0x11c   :  { %1154 = vtanh.f32 %v193_v20 }
 0x11d   :  { %1156 = vtanh.f32 %v188_v22  ;;  %v1088_v23 = vpop.f32.mrb[4].mxu0 }
 0x11e   :  { %v203_v24 = vadd.f32 %v1088_v23, %v1026_v14  ;;  %v197_v25 = vpop.f32.mrb[5].mxu0 }
 0x11f   :  { %v198_v26 = vadd.f32 %v1026_v14, %v197_v25 }
 0x120   :  { %1158 = vtanh.f32 %v203_v24 }
 0x121   :  { %1160 = vtanh.f32 %v198_v26  ;;  %v1091_v28 = vpop.f32.mrb[6].mxu0 }
 0x122   :  { %v1151_v29 = vpop.eup %1150  ;;  %v213_v30 = vadd.f32 %v1091_v28, %v1026_v14  ;;  %v207_v31 = vpop.f32.mrb[7].mxu0 }
 0x123   :  { %v1153_v32 = vpop.eup %1152  ;;  %v208_v33 = vadd.f32 %v1026_v14, %v207_v31  ;;  %v232_v34 = vmul.f32 %v1151_v29, %v1035_v27  ;;  %v273_v31 = vld [vmem:[#allocation6] sm:$0xff] }
 0x124   :  { %1162 = vtanh.f32 %v213_v30  ;;  %v231_v36 = vmul.f32 %v1153_v32, %v1035_v27  ;;  %vm274_vm8 = vcmp.eq.f32.partialorder %v273_v31, 0.0 }
 0x125   :  { %1164 = vtanh.f32 %v208_v33  ;;  %v242_v35 = vsel %vm86_vm0, %v232_v34, 0.0 }
 0x126   :  { %v1155_v37 = vpop.eup %1154  ;;  %243 = vadd.xlane.f32.xlu0 %v242_v35  ;;  %v239_v41 = vsel %vm86_vm0, %v231_v36, 0.0 }
 0x127   :  { %v1157_v38 = vpop.eup %1156  ;;  %v234_v39 = vmul.f32 %v1155_v37, %v1035_v27 }
 0x128   :  { %v233_v42 = vmul.f32 %v1157_v38, %v1035_v27 }
 0x129   :  { %v248_v40 = vsel %vm86_vm0, %v234_v39, 0.0 }
 0x12a   :  { %v1159_v43 = vpop.eup %1158  ;;  %249 = vadd.xlane.f32.xlu1 %v248_v40  ;;  %240 = vadd.xlane.f32.xlu0 %v239_v41  ;;  %v245_v46 = vsel %vm86_vm0, %v233_v42, 0.0 }
 0x12b   :  { %v1161_v44 = vpop.eup %1160  ;;  %v236_v47 = vmul.f32 %v1159_v43, %v1035_v27 }
 0x12c   :  { %v235_v45 = vmul.f32 %v1161_v44, %v1035_v27  ;;  %v1293_v44 = vmov 0.0  }
 0x12d   :  { %v254_v52 = vsel %vm86_vm0, %v236_v47, 0.0  ;;  %1092 = vmatprep.subr.mxu1 %v1293_v44  ;;  %1122 = vmatprep.subr.mxu0 %v1293_v44 }
 0x12e   :  { %v1163_v48 = vpop.eup %1162  ;;  %246 = vadd.xlane.f32.xlu1 %v245_v46  ;;  %v251_v49 = vsel %vm86_vm0, %v235_v45, 0.0  ;;  %1093 = vmatpush3.msra.mxu1 %v1381_v5  ;;  %v1295_v46 = vmov 1966171168  }
 0x12f   :  { %v1165_v50 = vpop.eup %1164  ;;  %252 = vadd.xlane.f32.xlu0 %v251_v49  ;;  %v238_v53 = vmul.f32 %v1163_v48, %v1035_v27  ;;  %1094 = vmatprep.mubr.msk.f32.mxu1 %vm1294_vm10, %v1293_v44  ;;  %v348_v47 = vunpack.c.l.s4 %v1295_v46 }
 0x130   :  { %v237_v51 = vmul.f32 %v1165_v50, %v1035_v27  ;;  %1097 = vmatprep.subr.mxu1 %v1293_v44  ;;  %1123 = vmatpush3.msra.mxu0 %v1403_v12 }
 0x131   :  { %v260_v55 = vsel %vm86_vm0, %v238_v53, 0.0  ;;  %1124 = vmatprep.mubr.msk.f32.mxu0 %vm1294_vm10, %v1293_v44  ;;  %v349_v48 = vunpack.c.0.s8 %v348_v47 }
 0x132   :  { %255 = vadd.xlane.f32.xlu1 %v254_v52  ;;  %v257_v54 = vsel %vm86_vm0, %v237_v51, 0.0 }
 0x133   :  { %258 = vadd.xlane.f32.xlu0 %v257_v54  ;;  %v352_v49 = vsub.s32 %v349_v48, %v1427_v59 }
 0x136   :  { %261 = vadd.xlane.f32.xlu1 %v260_v55 }
 0x1b3   :  { %v244_v57 = vpop.xlane.xlu0 %243 }
 0x1b4   :  { %v266_v1 = vadd.f32 %v264_v60, %v244_v57 }
 0x1b6   :  { %v292_v15 = vrot.slane %v266_v1, %v287_v0 }
 0x1b7   :  { %v250_v61 = vpop.xlane.xlu1 %249  ;;  %v241_v62 = vpop.xlane.xlu0 %240 }
 0x1b8   :  { %v265_v63 = vadd.f32 %v264_v60, %v241_v62  ;;  %v268_v2 = vadd.f32 %v264_v60, %v250_v61 }
 0x1ba   :  { %v288_v3 = vrot.slane %v265_v63, %v287_v0  ;;  %v300_v18 = vrot.slane %v268_v2, %v287_v0 }
 0x1bb   :  { %v247_v4 = vpop.xlane.xlu1 %246 }
 0x1bc   :  { %v267_v6 = vadd.f32 %v264_v60, %v247_v4  ;;  %v253_v14 = vpop.xlane.xlu0 %252  ;;  %v318_v19 = vsel %vm317_vm1, %v292_v15, %v288_v3 }
 0x1bd   :  { %v269_v16 = vadd.f32 %v264_v60, %v253_v14 }
 0x1be   :  { %v296_v17 = vrot.slane %v267_v6, %v287_v0 }
 0x1bf   :  { %v304_v20 = vrot.slane %v269_v16, %v287_v0  ;;  %v256_v21 = vpop.xlane.xlu1 %255 }
 0x1c0   :  { %v320_v22 = vsel %vm319_vm2, %v296_v17, %v318_v19  ;;  %v270_v23 = vadd.f32 %v264_v60, %v256_v21  ;;  %v259_v24 = vpop.xlane.xlu0 %258 }
 0x1c1   :  { %v322_v25 = vsel %vm321_vm3, %v300_v18, %v320_v22  ;;  %v271_v26 = vadd.f32 %v264_v60, %v259_v24 }
 0x1c2   :  { %v324_v27 = vsel %vm323_vm4, %v304_v20, %v322_v25  ;;  %v308_v28 = vrot.slane %v270_v23, %v287_v0 }
 0x1c3   :  { %v312_v29 = vrot.slane %v271_v26, %v287_v0  ;;  %v262_v30 = vpop.xlane.xlu1 %261 }
 0x1c4   :  { %v272_v32 = vadd.f32 %v264_v60, %v262_v30  ;;  %v326_v33 = vsel %vm325_vm5, %v308_v28, %v324_v27 }
 0x1c5   :  { %v328_v35 = vsel %vm327_vm6, %v312_v29, %v326_v33 }
 0x1c6   :  { %v316_v34 = vrot.slane %v272_v32, %v287_v0 }
 0x1c8   :  { %v330_v36 = vsel %vm329_vm7, %v316_v34, %v328_v35 }
 0x1c9   :  { %v332_v37 = vsel %vm274_vm8, -10000.0, %v330_v36 }
 0x1ca   :  { %v334_v38 = vsel %vm333_vm9, %v332_v37, -inf }
 0x1cb   :  { %335 = vmax.xlane.f32.xlu0 %v334_v38 }
 0x258   :  { %v336_v39 = vpop.xlane.xlu0 %335 }
 0x259   :  { %v337_v40 = vsub.f32 %v332_v37, %v336_v39 }
 0x25b   :  { %v338_v41 = vmul.f32 1.442695, %v337_v40 }
 0x25d   :  { %1166 = vpow2.f32 %v338_v41 }
 0x267   :  { %v1167_v42 = vpop.eup %1166 }
 0x268   :  { %v340_v43 = vsel %vm333_vm9, %v1167_v42, 0.0 }
 0x269   :  { %341 = vadd.xlane.f32.xlu1 %v340_v43 }
 0x2f6   :  { %v342_v45 = vpop.xlane.xlu1 %341 }
 0x2f7   :  { %1168 = vrcp.f32 %v342_v45 }
 0x301   :  { %v1169_v50 = vpop.eup %1168 }
 0x302   :  { %v344_v51 = vmul.f32 %v1169_v50, %v1167_v42 }
 0x304   :  { %v346_v52 = vcombine.high %v344_v51, %v344_v51  ;;  %995 = vst.msk [vmem:[#allocation10] sm:$0xff] %vm333_vm9, %v344_v51  ;;  %v353_v5 = vrot.slane %v344_v51, %v352_v49 }
 0x306   :  { %v360_v53 = vrot.slane %v346_v52, %v352_v49  ;;  %v361_v54 = vcombine.high %v353_v5, %v353_v5  ;;  %v369_v55 = vrot.slane %v353_v5, %v352_v49 }
 0x308   :  { %v376_v56 = vrot.slane %v360_v53, %v352_v49  ;;  %1095 = vmatmul.mubr.msk.f32.vlgmr.msra.gmra.mrb[0].mxu1 %vm333_vm9, %v369_v55  ;;  %v383_v12 = vrot.slane %v361_v54, %v352_v49  ;;  %v391_v58 = vcombine.high %v369_v55, %v369_v55 }
 0x309   :  { %1098 = vmatpush3.msra.mxu1 %v1385_v7  ;;  %1099 = vmatprep.mubr.msk.f32.mxu1 %vm1294_vm10, %v1293_v44 }
 0x30a   :  { %1102 = vmatprep.subr.mxu1 %v1293_v44  ;;  %v392_v57 = vcombine.high %v376_v56, %v376_v56  ;;  %v393_v7 = vcombine.high %v383_v12, %v383_v12 }
 0x30c   :  { %1100 = vmatmul.mubr.msk.f32.vlgmr.msra.gmra.mrb[2].mxu1 %vm333_vm9, %v383_v12  ;;  %1125 = vmatmul.mubr.msk.f32.vlgmr.msra.gmra.mrb[8].mxu0 %vm333_vm9, %v392_v57 }
 0x30d   :  { %1103 = vmatpush3.msra.mxu1 %v1387_v8  ;;  %1104 = vmatprep.mubr.msk.f32.mxu1 %vm1294_vm10, %v1293_v44  ;;  %v362_v8 = vcombine.high %v360_v53, %v360_v53 }
 0x30e   :  { %1107 = vmatprep.subr.mxu1 %v1293_v44 }
 0x310   :  { %1105 = vmatmul.mubr.msk.f32.vlgmr.msra.gmra.mrb[4].mxu1 %vm333_vm9, %v391_v58 }
 0x311   :  { %1108 = vmatpush3.msra.mxu1 %v1393_v9  ;;  %1109 = vmatprep.mubr.msk.f32.mxu1 %vm1294_vm10, %v1293_v44  ;;  %v390_v9 = vrot.slane %v362_v8, %v352_v49 }
 0x312   :  { %1112 = vmatprep.subr.mxu1 %v1293_v44 }
 0x313   :  { %v394_v59 = vcombine.high %v390_v9, %v390_v9 }
 0x314   :  { %1110 = vmatmul.mubr.msk.f32.vlgmr.msra.gmra.mrb[6].mxu1 %vm333_vm9, %v393_v7 }
 0x315   :  { %1113 = vmatpush3.msra.mxu1 %v1395_v10  ;;  %1114 = vmatprep.mubr.msk.f32.mxu1 %vm1294_vm10, %v1293_v44 }
 0x316   :  { %1117 = vmatprep.subr.mxu1 %v1293_v44 }
 0x318   :  { %1115 = vmatmul.mubr.msk.f32.vlgmr.msra.gmra.mrb[8].mxu1 %vm333_vm9, %v376_v56 }
 0x319   :  { %1118 = vmatpush3.msra.mxu1 %v1401_v11  ;;  %1119 = vmatprep.mubr.msk.f32.mxu1 %vm1294_vm10, %v1293_v44 }
 0x31a   :  { %1127 = vmatprep.subr.mxu1 %v1293_v44 }
 0x31c   :  { %1120 = vmatmul.mubr.msk.f32.vlgmr.msra.gmra.mrb[10].mxu1 %vm333_vm9, %v390_v9 }
 0x31d   :  { %1128 = vmatpush3.msra.mxu1 %v1409_v13  ;;  %1129 = vmatprep.mubr.msk.f32.mxu1 %vm1294_vm10, %v1293_v44 }
 0x320   :  { %1130 = vmatmul.mubr.msk.f32.vlgmr.msra.gmra.mrb[12].mxu1 %vm333_vm9, %v394_v59 }
 0x321   :  { %1247 = shalt.err (!%p1244_p0)
}
 0x322   :  { %s1248_s21 = scalar_lea.hbm %s1507_s7, 128 }
 0x323   :  { %p1249_p1 = scmp.ne.s32.totalorder %s1507_s7, %s1248_s21  ;;  %p1252_p2 = scmp.lt.u32.totalorder %s1248_s21, %s1507_s7 }
 0x325   :  { %p1254_p3 = pnand %p1252_p2, %p1249_p1 }
 0x327   :  { %1257 = shalt.err (!%p1254_p3)
}
 0x328   :  { %1015 = dma.vmem_to_hbm [thread:$0]  %s1013_s17, 128, %s1507_s7, [#allocation11]  }
 0x329   :  { %s1297_s7 = smov [#allocation9]  }
 0x32a   :  { %s1002_s28 = sshll.u32 %s1297_s7, 4  ;;  %s1003_s28 = int_to_ptr.vmem [resolvable:$true] %s1002_s28 }
 0x32b   :  { %s1258_s29 = scalar_lea.vmem %s1003_s28, 128  ;;  %p1263_p5 = scmp.lt.s32.totalorder %s1003_s28, %s1003_s28 }
 0x32c   :  { %p1259_p4 = scmp.ne.s32.totalorder %s1003_s28, %s1258_s29  ;;  %p1264_p6 = scmp.lt.s32.totalorder %s1258_s29, %s1258_s29 }
 0x32e   :  { %p1265_p7 = por %p1264_p6, %p1263_p5 }
 0x330   :  { %p1266_p8 = pnand %p1265_p7, %p1259_p4 }
 0x3db   :  { %v463_v10 = vpop.f32.mrb[0].mxu1 }
 0x3dc   :  { %v1096_v11 = vpop.f32.mrb[1].mxu1 }
 0x3df   :  { %v535_v13 = vpop.f32.mrb[2].mxu1  ;;  %v895_v60 = vpop.f32.mrb[8].mxu0 }
 0x3e0   :  { %v979_v61 = vrot.slane %v535_v13, 7  ;;  %v1101_v62 = vpop.f32.mrb[3].mxu1  ;;  %v1126_v63 = vpop.f32.mrb[9].mxu0  ;;  %v989_v24 = vrot.slane %v895_v60, 2 }
 0x3e2   :  { %v980_v0 = vsel %vm317_vm1, %v979_v61, %v463_v10 }
 0x3e3   :  { %v607_v1 = vpop.f32.mrb[4].mxu1 }
 0x3e4   :  { %v981_v2 = vrot.slane %v607_v1, 6  ;;  %v1106_v3 = vpop.f32.mrb[5].mxu1 }
 0x3e6   :  { %v982_v4 = vsel %vm319_vm2, %v981_v2, %v980_v0 }
 0x3e7   :  { %v679_v6 = vpop.f32.mrb[6].mxu1 }
 0x3e8   :  { %v983_v14 = vrot.slane %v679_v6, 5  ;;  %v1111_v15 = vpop.f32.mrb[7].mxu1 }
 0x3ea   :  { %v984_v16 = vsel %vm321_vm3, %v983_v14, %v982_v4 }
 0x3eb   :  { %v751_v17 = vpop.f32.mrb[8].mxu1 }
 0x3ec   :  { %v985_v18 = vrot.slane %v751_v17, 4  ;;  %v1116_v19 = vpop.f32.mrb[9].mxu1 }
 0x3ee   :  { %v986_v20 = vsel %vm323_vm4, %v985_v18, %v984_v16 }
 0x3ef   :  { %v823_v21 = vpop.f32.mrb[10].mxu1 }
 0x3f0   :  { %v987_v22 = vrot.slane %v823_v21, 3  ;;  %v1121_v23 = vpop.f32.mrb[11].mxu1 }
 0x3f2   :  { %v988_v25 = vsel %vm325_vm5, %v987_v22, %v986_v20 }
 0x3f3   :  { %v967_v26 = vpop.f32.mrb[12].mxu1  ;;  %v990_v27 = vsel %vm327_vm6, %v989_v24, %v988_v25 }
 0x3f4   :  { %v991_v28 = vrot.slane %v967_v26, 1  ;;  %v1131_v29 = vpop.f32.mrb[13].mxu1 }
 0x3f6   :  { %v992_v30 = vsel %vm329_vm7, %v991_v28, %v990_v27 }
 0x3f7   :  { %994 = vst.msk [vmem:[#allocation9] sm:$0xff] %vm86_vm0, %v992_v30 }
 0x3f8   :  { %1269 = shalt.err (!%p1266_p8)
}
 0x3f9   :  { %s1270_s9 = scalar_lea.hbm %s1506_s6, 128 }
 0x3fa   :  { %p1271_p9 = scmp.ne.s32.totalorder %s1506_s6, %s1270_s9  ;;  %p1274_p10 = scmp.lt.u32.totalorder %s1270_s9, %s1506_s6 }
 0x3fc   :  { %p1276_p11 = pnand %p1274_p10, %p1271_p9 }
 0x3fe   :  { %1279 = shalt.err (!%p1276_p11)
}
 0x3ff   :  { %1005 = dma.vmem_to_hbm [thread:$0]  %s1003_s28, 128, %s1506_s6, [#allocation5]  }
 0x400   :  { %1284 = dma.done.wait [#allocation5], 128  }
 0x401   :  { %1285 = vsyncadd [#allocation5], 4294967168 }
 0x402   :  { %1286 = dma.done.wait [#allocation11], 128  }
 0x403   :  { %1287 = vsyncadd [#allocation11], 4294967168 }
 0x404   :  { %1022 = vsyncpa [#allocation4], 1 }
 0x405   :  { %1023 = vsyncpa [#allocation7], 1 }
 0x406   :  { %1024 = vsyncpa [#allocation5], 1 }
 0x407   :  { %1025 = vsyncpa [#allocation11], 1 }

</bundles_post_ra>
